<compile_context>
chip_gen: v7x
topology: tpu7x:2x2x1
jax: 0.10.0
libtpu: 0.0.40
codegen_flags: <defaults>
</compile_context>

<pallas_src>
import functools
import math

import jax
import jax.numpy as jnp
from jax.experimental import pallas as pl
from jax.experimental.pallas import tpu as pltpu


# ---------------------------------------------------------------------------
# nearest-neighbour index helpers (match PyTorch F.interpolate, mode='nearest')
# ---------------------------------------------------------------------------
def _nearest_indices(in_size: int, scale: float):
    """PyTorch 'nearest' index map: src = floor(dst * in_size / out_size)."""
    out_size = int(math.floor(in_size * scale))
    assert out_size >= 1, "scale too small for this spatial size"
    idx = tuple(min(int(math.floor(d * in_size / out_size)), in_size - 1)
                for d in range(out_size))
    return out_size, idx


def _uniform_stride(in_size: int, out_size: int, idx):
    """Return integer stride k if idx == (0, k, 2k, ...), else None."""
    if in_size % out_size:
        return None
    k = in_size // out_size
    return k if idx == tuple(range(0, in_size, k)) else None


def _sublane_multiple(dtype) -> int:
    """Sublane tile multiple: 8 for 4-byte, 16 for 2-byte, 32 for 1-byte dtypes."""
    return max(8, 32 // jnp.dtype(dtype).itemsize)


def _block_byte_budget() -> int:
    """Per-input-block byte budget, derived from the chip's VMEM capacity.

    ~2 MiB blocks on v7x (64 MiB VMEM), ~4 MiB on v5e/v6e (128 MiB); everything is
    double-buffered by the BlockSpec pipeline so this stays well inside the 32 MiB
    scoped-VMEM limit we request below.
    """
    cap = 128 * 1024 * 1024
    try:
        info = pltpu.get_tpu_info()
        cap = int(getattr(info, "vmem_capacity_bytes", cap) or cap)
    except Exception:
        pass
    return int(min(4 * 1024 * 1024, max(1 * 1024 * 1024, cap // 32)))


# ---------------------------------------------------------------------------
# fast path: uniform integer stride downsample with lane-dense output (wo >= 128)
# ---------------------------------------------------------------------------
def _fast_kernel(x_ref, sel_ref, o_ref):
    # One MXU matmul per tile.  x_ref is a (tm, kh*w) slab: row m holds the kh
    # input rows feeding output row m, flattened.  The one-hot `sel` picks input
    # column j*kw of the kept (kh-index 0) row for every output column j, so the
    # H- and W-decimation are a single dot.  Exact (one-hot), and the MXU work is
    # fully hidden under the (dominant, double-buffered) HBM read.
    o_ref[...] = jnp.dot(x_ref[...], sel_ref[...],
                         preferred_element_type=jnp.float32).astype(o_ref.dtype)


def _pick_row_tile(m, row_bytes, sub, budget):
    """Rows per grid step: one step for tiny tensors, otherwise a sublane-aligned
    divisor of m giving blocks <= budget and >= 2 grid steps (pipelining / megacore)."""
    total = m * row_bytes
    if total <= (1 << 20):                       # < 1 MiB total: single fat step
        return m
    cap = min(max(sub, budget // row_bytes), max(sub, m // 2))
    best = None
    for d in range(sub, min(m, cap) + 1, sub):   # sublane-aligned divisors only
        if m % d == 0:
            best = d
    if best is not None:
        return best
    if total <= 2 * budget:                      # awkward m but still small: one step
        return m
    return None                                  # give up -> general path


def _downsample_fast(x, ho, wo, kh, kw):
    n, c, h, w = x.shape
    m = n * c * ho
    khw = kh * w
    item = jnp.dtype(x.dtype).itemsize
    sel_bytes = khw * wo * item
    if sel_bytes > 2 * 1024 * 1024:              # keep the resident one-hot small
        return None
    tm = _pick_row_tile(m, khw * item, _sublane_multiple(x.dtype), _block_byte_budget())
    if tm is None:
        return None

    # Free reshape: row (b*ho + oh) of x2 holds x[b_n, b_c, oh*kh:(oh+1)*kh, :].
    x2 = x.reshape(m, khw)
    col = jnp.arange(khw, dtype=jnp.int32)[:, None]
    sel = (col == (jnp.arange(wo, dtype=jnp.int32) * kw)[None, :]).astype(x.dtype)

    out2d = pl.pallas_call(
        _fast_kernel,
        out_shape=jax.ShapeDtypeStruct((m, wo), x.dtype),
        grid_spec=pltpu.PrefetchScalarGridSpec(
            num_scalar_prefetch=0,
            grid=(m // tm,),
            in_specs=[
                pl.BlockSpec((tm, khw), lambda i: (i, 0)),   # auto double-buffered DMA
                pl.BlockSpec((khw, wo), lambda i: (0, 0)),   # resident one-hot selector
            ],
            out_specs=pl.BlockSpec((tm, wo), lambda i: (i, 0)),  # wo >= 128: lane-dense
        ),
        compiler_params=pltpu.CompilerParams(
            dimension_semantics=("parallel",),
            vmem_limit_bytes=32 * 1024 * 1024,
        ),
        cost_estimate=pl.CostEstimate(
            flops=2 * m * khw * wo, transcendentals=0,
            bytes_accessed=(m * khw + m * wo) * item + sel_bytes),
    )(x2, sel)
    return out2d.reshape(n, c, ho, wo)


# ---------------------------------------------------------------------------
# general path: arbitrary scale (non-integer stride, upsampling, small wo)
# ---------------------------------------------------------------------------
def _make_general_kernel(tc):
    def kernel(sh_ref, sw_ref, x_ref, o_ref):
        sh = sh_ref[...]                     # (ho, h) one-hot row selector
        sw = sw_ref[...]                     # (w, wo) one-hot column selector
        for ci in range(tc):                 # static unroll, tc <= 8
            rows = jnp.dot(sh, x_ref[ci], preferred_element_type=jnp.float32)  # (ho, w)
            y = jnp.dot(rows, sw, preferred_element_type=jnp.float32)          # (ho, wo)
            o_ref[ci] = y.astype(o_ref.dtype)
    return kernel


def _pick_channel_tile(b, ch_bytes, budget):
    cap = int(max(1, min(8, budget // max(ch_bytes, 1))))
    tc = 1
    for d in range(1, min(b, cap) + 1):
        if b % d == 0:
            tc = d
    return tc


def _downsample_general(x, ho, wo, idx_h, idx_w):
    n, c, h, w = x.shape
    b = n * c
    item = jnp.dtype(x.dtype).itemsize
    tc = _pick_channel_tile(b, h * w * item, _block_byte_budget())
    xb = x.reshape(b, h, w)

    ih = jnp.asarray(idx_h, dtype=jnp.int32)
    iw = jnp.asarray(idx_w, dtype=jnp.int32)
    sh = (jnp.arange(h, dtype=jnp.int32)[None, :] == ih[:, None]).astype(x.dtype)  # (ho, h)
    sw = (jnp.arange(w, dtype=jnp.int32)[:, None] == iw[None, :]).astype(x.dtype)  # (w, wo)

    outb = pl.pallas_call(
        _make_general_kernel(tc),
        out_shape=jax.ShapeDtypeStruct((b, ho, wo), x.dtype),
        grid_spec=pltpu.PrefetchScalarGridSpec(
            num_scalar_prefetch=0,
            grid=(b // tc,),
            in_specs=[
                pl.BlockSpec((ho, h), lambda i: (0, 0)),
                pl.BlockSpec((w, wo), lambda i: (0, 0)),
                pl.BlockSpec((tc, h, w), lambda i: (i, 0, 0)),
            ],
            out_specs=pl.BlockSpec((tc, ho, wo), lambda i: (i, 0, 0)),
        ),
        compiler_params=pltpu.CompilerParams(
            dimension_semantics=("parallel",),
            vmem_limit_bytes=32 * 1024 * 1024,
        ),
        cost_estimate=pl.CostEstimate(
            flops=2 * b * (ho * h * w + ho * w * wo), transcendentals=0,
            bytes_accessed=b * (h * w + ho * wo) * item),
    )(sh, sw, xb)
    return outb.reshape(n, c, ho, wo)


# ---------------------------------------------------------------------------
# public entry point
# ---------------------------------------------------------------------------
@functools.partial(jax.jit, static_argnums=(1,))
def downsample(x: jax.Array, scale: float) -> jax.Array:
    """Nearest-neighbour resize of an NCHW tensor by `scale` (Pallas TPU kernels)."""
    n, c, h, w = x.shape
    ho, idx_h = _nearest_indices(h, scale)
    wo, idx_w = _nearest_indices(w, scale)

    kh = _uniform_stride(h, ho, idx_h)
    kw = _uniform_stride(w, wo, idx_w)
    # Fast path only when stores are lane-dense (wo >= 128) and strides are integer.
    if kh is not None and kw is not None and wo >= 128:
        out = _downsample_fast(x, ho, wo, kh, kw)
        if out is not None:
            return out
    return _downsample_general(x, ho, wo, idx_h, idx_w)


def downsample_ref(x: jax.Array, scale: float) -> jax.Array:
    """Pure-JAX reference (matches F.interpolate(x, scale_factor=scale), nearest)."""
    _, _, h, w = x.shape
    _, idx_h = _nearest_indices(h, scale)
    _, idx_w = _nearest_indices(w, scale)
    ih = jnp.asarray(idx_h, dtype=jnp.int32)
    iw = jnp.asarray(idx_w, dtype=jnp.int32)
    return x[:, :, ih, :][:, :, :, iw]


if __name__ == "__main__":
    key = jax.random.PRNGKey(0)
    k1, k2 = jax.random.split(key)

    # Primary case from the module's usage: small NCHW feature map, scale 0.5.
    x1 = jax.random.normal(k1, (2, 4, 16, 16), dtype=jnp.float32)
    out1 = jax.block_until_ready(downsample(x1, 0.5))
    ref1 = downsample_ref(x1, 0.5)
    assert out1.shape == (2, 4, 8, 8), out1.shape
    assert bool(jnp.all(out1 == ref1)), "general-path mismatch vs reference"

    # Wider map so the lane-dense fast path (wo >= 128) is exercised as well.
    x2 = jax.random.normal(k2, (1, 2, 32, 256), dtype=jnp.float32)
    out2 = jax.block_until_ready(downsample(x2, 0.5))
    ref2 = downsample_ref(x2, 0.5)
    assert out2.shape == (1, 2, 16, 128), out2.shape
    assert bool(jnp.all(out2 == ref2)), "fast-path mismatch vs reference"

    print("KERNEL_OK")
</pallas_src>

<mosaic_0001>
module attributes {stable_mosaic.version = 11 : i64} {
  func.func @kernel(%arg0: i32, %arg1: memref<8x16xf32, #tpu.memory_space<vmem>>, %arg2: memref<16x8xf32, #tpu.memory_space<vmem>>, %arg3: memref<8x16x16xf32, #tpu.memory_space<vmem>>, %arg4: memref<8x8x8xf32, #tpu.memory_space<vmem>>) attributes {dimension_semantics = [#tpu.dimension_semantics<parallel>], iteration_bounds = array<i64: 1>, scalar_prefetch = 0 : i64, scratch_operands = 0 : i64, tpu.core_type = #tpu.core_type<tc>, window_params = [{pipeline_mode = #tpu.pipeline_mode<synchronous>, transform_indices = @transform_0, window_bounds = array<i64: 8, 16>}, {pipeline_mode = #tpu.pipeline_mode<synchronous>, transform_indices = @transform_1, window_bounds = array<i64: 16, 8>}, {transform_indices = @transform_2, window_bounds = array<i64: 8, 16, 16>}, {transform_indices = @transform_3, window_bounds = array<i64: 8, 8, 8>}]} {
    %c0 = arith.constant 0 : index
    %c0_0 = arith.constant 0 : index
    %0 = vector.load %arg1[%c0, %c0_0] : memref<8x16xf32, #tpu.memory_space<vmem>>, vector<8x16xf32>
    %c0_1 = arith.constant 0 : index
    %c0_2 = arith.constant 0 : index
    %1 = vector.load %arg2[%c0_1, %c0_2] : memref<16x8xf32, #tpu.memory_space<vmem>>, vector<16x8xf32>
    %c0_3 = arith.constant 0 : index
    %c0_4 = arith.constant 0 : index
    %c0_5 = arith.constant 0 : index
    %2 = vector.load %arg3[%c0_3, %c0_4, %c0_5] : memref<8x16x16xf32, #tpu.memory_space<vmem>>, vector<1x16x16xf32>
    %3 = vector.shape_cast %2 : vector<1x16x16xf32> to vector<16x16xf32>
    %cst = arith.constant dense<0.000000e+00> : vector<8x16xf32>
    %4 = tpu.matmul %0, %3, %cst {dimension_numbers = #tpu.dot_dimension_numbers<[1], [0], [0], [1], [0, 0, 1, 1], [], []>} : vector<8x16xf32>, vector<16x16xf32>, vector<8x16xf32> -> vector<8x16xf32>
    %cst_6 = arith.constant dense<0.000000e+00> : vector<8x8xf32>
    %5 = tpu.matmul %4, %1, %cst_6 {dimension_numbers = #tpu.dot_dimension_numbers<[1], [0], [0], [1], [0, 0, 1, 1], [], []>} : vector<8x16xf32>, vector<16x8xf32>, vector<8x8xf32> -> vector<8x8xf32>
    %c0_7 = arith.constant 0 : index
    %c0_8 = arith.constant 0 : index
    %c0_9 = arith.constant 0 : index
    %6 = vector.load %arg4[%c0_7, %c0_8, %c0_9] : memref<8x8x8xf32, #tpu.memory_space<vmem>>, vector<1x8x8xf32>
    %7 = vector.shape_cast %6 : vector<1x8x8xf32> to vector<8x8xf32>
    %8 = vector.shape_cast %5 : vector<8x8xf32> to vector<1x8x8xf32>
    tpu.vector_store %arg4[%c0_7, %c0_8, %c0_9], %8 {strides = array<i32>} : memref<8x8x8xf32, #tpu.memory_space<vmem>>, vector<1x8x8xf32>,
    %c1 = arith.constant 1 : index
    %c0_10 = arith.constant 0 : index
    %c0_11 = arith.constant 0 : index
    %9 = vector.load %arg3[%c1, %c0_10, %c0_11] : memref<8x16x16xf32, #tpu.memory_space<vmem>>, vector<1x16x16xf32>
    %10 = vector.shape_cast %9 : vector<1x16x16xf32> to vector<16x16xf32>
    %cst_12 = arith.constant dense<0.000000e+00> : vector<8x16xf32>
    %11 = tpu.matmul %0, %10, %cst_12 {dimension_numbers = #tpu.dot_dimension_numbers<[1], [0], [0], [1], [0, 0, 1, 1], [], []>} : vector<8x16xf32>, vector<16x16xf32>, vector<8x16xf32> -> vector<8x16xf32>
    %cst_13 = arith.constant dense<0.000000e+00> : vector<8x8xf32>
    %12 = tpu.matmul %11, %1, %cst_13 {dimension_numbers = #tpu.dot_dimension_numbers<[1], [0], [0], [1], [0, 0, 1, 1], [], []>} : vector<8x16xf32>, vector<16x8xf32>, vector<8x8xf32> -> vector<8x8xf32>
    %c1_14 = arith.constant 1 : index
    %c0_15 = arith.constant 0 : index
    %c0_16 = arith.constant 0 : index
    %13 = vector.load %arg4[%c1_14, %c0_15, %c0_16] : memref<8x8x8xf32, #tpu.memory_space<vmem>>, vector<1x8x8xf32>
    %14 = vector.shape_cast %13 : vector<1x8x8xf32> to vector<8x8xf32>
    %15 = vector.shape_cast %12 : vector<8x8xf32> to vector<1x8x8xf32>
    tpu.vector_store %arg4[%c1_14, %c0_15, %c0_16], %15 {strides = array<i32>} : memref<8x8x8xf32, #tpu.memory_space<vmem>>, vector<1x8x8xf32>,
    %c2 = arith.constant 2 : index
    %c0_17 = arith.constant 0 : index
    %c0_18 = arith.constant 0 : index
    %16 = vector.load %arg3[%c2, %c0_17, %c0_18] : memref<8x16x16xf32, #tpu.memory_space<vmem>>, vector<1x16x16xf32>
    %17 = vector.shape_cast %16 : vector<1x16x16xf32> to vector<16x16xf32>
    %cst_19 = arith.constant dense<0.000000e+00> : vector<8x16xf32>
    %18 = tpu.matmul %0, %17, %cst_19 {dimension_numbers = #tpu.dot_dimension_numbers<[1], [0], [0], [1], [0, 0, 1, 1], [], []>} : vector<8x16xf32>, vector<16x16xf32>, vector<8x16xf32> -> vector<8x16xf32>
    %cst_20 = arith.constant dense<0.000000e+00> : vector<8x8xf32>
    %19 = tpu.matmul %18, %1, %cst_20 {dimension_numbers = #tpu.dot_dimension_numbers<[1], [0], [0], [1], [0, 0, 1, 1], [], []>} : vector<8x16xf32>, vector<16x8xf32>, vector<8x8xf32> -> vector<8x8xf32>
    %c2_21 = arith.constant 2 : index
    %c0_22 = arith.constant 0 : index
    %c0_23 = arith.constant 0 : index
    %20 = vector.load %arg4[%c2_21, %c0_22, %c0_23] : memref<8x8x8xf32, #tpu.memory_space<vmem>>, vector<1x8x8xf32>
    %21 = vector.shape_cast %20 : vector<1x8x8xf32> to vector<8x8xf32>
    %22 = vector.shape_cast %19 : vector<8x8xf32> to vector<1x8x8xf32>
    tpu.vector_store %arg4[%c2_21, %c0_22, %c0_23], %22 {strides = array<i32>} : memref<8x8x8xf32, #tpu.memory_space<vmem>>, vector<1x8x8xf32>,
    %c3 = arith.constant 3 : index
    %c0_24 = arith.constant 0 : index
    %c0_25 = arith.constant 0 : index
    %23 = vector.load %arg3[%c3, %c0_24, %c0_25] : memref<8x16x16xf32, #tpu.memory_space<vmem>>, vector<1x16x16xf32>
    %24 = vector.shape_cast %23 : vector<1x16x16xf32> to vector<16x16xf32>
    %cst_26 = arith.constant dense<0.000000e+00> : vector<8x16xf32>
    %25 = tpu.matmul %0, %24, %cst_26 {dimension_numbers = #tpu.dot_dimension_numbers<[1], [0], [0], [1], [0, 0, 1, 1], [], []>} : vector<8x16xf32>, vector<16x16xf32>, vector<8x16xf32> -> vector<8x16xf32>
    %cst_27 = arith.constant dense<0.000000e+00> : vector<8x8xf32>
    %26 = tpu.matmul %25, %1, %cst_27 {dimension_numbers = #tpu.dot_dimension_numbers<[1], [0], [0], [1], [0, 0, 1, 1], [], []>} : vector<8x16xf32>, vector<16x8xf32>, vector<8x8xf32> -> vector<8x8xf32>
    %c3_28 = arith.constant 3 : index
    %c0_29 = arith.constant 0 : index
    %c0_30 = arith.constant 0 : index
    %27 = vector.load %arg4[%c3_28, %c0_29, %c0_30] : memref<8x8x8xf32, #tpu.memory_space<vmem>>, vector<1x8x8xf32>
    %28 = vector.shape_cast %27 : vector<1x8x8xf32> to vector<8x8xf32>
    %29 = vector.shape_cast %26 : vector<8x8xf32> to vector<1x8x8xf32>
    tpu.vector_store %arg4[%c3_28, %c0_29, %c0_30], %29 {strides = array<i32>} : memref<8x8x8xf32, #tpu.memory_space<vmem>>, vector<1x8x8xf32>,
    %c4 = arith.constant 4 : index
    %c0_31 = arith.constant 0 : index
    %c0_32 = arith.constant 0 : index
    %30 = vector.load %arg3[%c4, %c0_31, %c0_32] : memref<8x16x16xf32, #tpu.memory_space<vmem>>, vector<1x16x16xf32>
    %31 = vector.shape_cast %30 : vector<1x16x16xf32> to vector<16x16xf32>
    %cst_33 = arith.constant dense<0.000000e+00> : vector<8x16xf32>
    %32 = tpu.matmul %0, %31, %cst_33 {dimension_numbers = #tpu.dot_dimension_numbers<[1], [0], [0], [1], [0, 0, 1, 1], [], []>} : vector<8x16xf32>, vector<16x16xf32>, vector<8x16xf32> -> vector<8x16xf32>
    %cst_34 = arith.constant dense<0.000000e+00> : vector<8x8xf32>
    %33 = tpu.matmul %32, %1, %cst_34 {dimension_numbers = #tpu.dot_dimension_numbers<[1], [0], [0], [1], [0, 0, 1, 1], [], []>} : vector<8x16xf32>, vector<16x8xf32>, vector<8x8xf32> -> vector<8x8xf32>
    %c4_35 = arith.constant 4 : index
    %c0_36 = arith.constant 0 : index
    %c0_37 = arith.constant 0 : index
    %34 = vector.load %arg4[%c4_35, %c0_36, %c0_37] : memref<8x8x8xf32, #tpu.memory_space<vmem>>, vector<1x8x8xf32>
    %35 = vector.shape_cast %34 : vector<1x8x8xf32> to vector<8x8xf32>
    %36 = vector.shape_cast %33 : vector<8x8xf32> to vector<1x8x8xf32>
    tpu.vector_store %arg4[%c4_35, %c0_36, %c0_37], %36 {strides = array<i32>} : memref<8x8x8xf32, #tpu.memory_space<vmem>>, vector<1x8x8xf32>,
    %c5 = arith.constant 5 : index
    %c0_38 = arith.constant 0 : index
    %c0_39 = arith.constant 0 : index
    %37 = vector.load %arg3[%c5, %c0_38, %c0_39] : memref<8x16x16xf32, #tpu.memory_space<vmem>>, vector<1x16x16xf32>
    %38 = vector.shape_cast %37 : vector<1x16x16xf32> to vector<16x16xf32>
    %cst_40 = arith.constant dense<0.000000e+00> : vector<8x16xf32>
    %39 = tpu.matmul %0, %38, %cst_40 {dimension_numbers = #tpu.dot_dimension_numbers<[1], [0], [0], [1], [0, 0, 1, 1], [], []>} : vector<8x16xf32>, vector<16x16xf32>, vector<8x16xf32> -> vector<8x16xf32>
    %cst_41 = arith.constant dense<0.000000e+00> : vector<8x8xf32>
    %40 = tpu.matmul %39, %1, %cst_41 {dimension_numbers = #tpu.dot_dimension_numbers<[1], [0], [0], [1], [0, 0, 1, 1], [], []>} : vector<8x16xf32>, vector<16x8xf32>, vector<8x8xf32> -> vector<8x8xf32>
    %c5_42 = arith.constant 5 : index
    %c0_43 = arith.constant 0 : index
    %c0_44 = arith.constant 0 : index
    %41 = vector.load %arg4[%c5_42, %c0_43, %c0_44] : memref<8x8x8xf32, #tpu.memory_space<vmem>>, vector<1x8x8xf32>
    %42 = vector.shape_cast %41 : vector<1x8x8xf32> to vector<8x8xf32>
    %43 = vector.shape_cast %40 : vector<8x8xf32> to vector<1x8x8xf32>
    tpu.vector_store %arg4[%c5_42, %c0_43, %c0_44], %43 {strides = array<i32>} : memref<8x8x8xf32, #tpu.memory_space<vmem>>, vector<1x8x8xf32>,
    %c6 = arith.constant 6 : index
    %c0_45 = arith.constant 0 : index
    %c0_46 = arith.constant 0 : index
    %44 = vector.load %arg3[%c6, %c0_45, %c0_46] : memref<8x16x16xf32, #tpu.memory_space<vmem>>, vector<1x16x16xf32>
    %45 = vector.shape_cast %44 : vector<1x16x16xf32> to vector<16x16xf32>
    %cst_47 = arith.constant dense<0.000000e+00> : vector<8x16xf32>
    %46 = tpu.matmul %0, %45, %cst_47 {dimension_numbers = #tpu.dot_dimension_numbers<[1], [0], [0], [1], [0, 0, 1, 1], [], []>} : vector<8x16xf32>, vector<16x16xf32>, vector<8x16xf32> -> vector<8x16xf32>
    %cst_48 = arith.constant dense<0.000000e+00> : vector<8x8xf32>
    %47 = tpu.matmul %46, %1, %cst_48 {dimension_numbers = #tpu.dot_dimension_numbers<[1], [0], [0], [1], [0, 0, 1, 1], [], []>} : vector<8x16xf32>, vector<16x8xf32>, vector<8x8xf32> -> vector<8x8xf32>
    %c6_49 = arith.constant 6 : index
    %c0_50 = arith.constant 0 : index
    %c0_51 = arith.constant 0 : index
    %48 = vector.load %arg4[%c6_49, %c0_50, %c0_51] : memref<8x8x8xf32, #tpu.memory_space<vmem>>, vector<1x8x8xf32>
    %49 = vector.shape_cast %48 : vector<1x8x8xf32> to vector<8x8xf32>
    %50 = vector.shape_cast %47 : vector<8x8xf32> to vector<1x8x8xf32>
    tpu.vector_store %arg4[%c6_49, %c0_50, %c0_51], %50 {strides = array<i32>} : memref<8x8x8xf32, #tpu.memory_space<vmem>>, vector<1x8x8xf32>,
    %c7 = arith.constant 7 : index
    %c0_52 = arith.constant 0 : index
    %c0_53 = arith.constant 0 : index
    %51 = vector.load %arg3[%c7, %c0_52, %c0_53] : memref<8x16x16xf32, #tpu.memory_space<vmem>>, vector<1x16x16xf32>
    %52 = vector.shape_cast %51 : vector<1x16x16xf32> to vector<16x16xf32>
    %cst_54 = arith.constant dense<0.000000e+00> : vector<8x16xf32>
    %53 = tpu.matmul %0, %52, %cst_54 {dimension_numbers = #tpu.dot_dimension_numbers<[1], [0], [0], [1], [0, 0, 1, 1], [], []>} : vector<8x16xf32>, vector<16x16xf32>, vector<8x16xf32> -> vector<8x16xf32>
    %cst_55 = arith.constant dense<0.000000e+00> : vector<8x8xf32>
    %54 = tpu.matmul %53, %1, %cst_55 {dimension_numbers = #tpu.dot_dimension_numbers<[1], [0], [0], [1], [0, 0, 1, 1], [], []>} : vector<8x16xf32>, vector<16x8xf32>, vector<8x8xf32> -> vector<8x8xf32>
    %c7_56 = arith.constant 7 : index
    %c0_57 = arith.constant 0 : index
    %c0_58 = arith.constant 0 : index
    %55 = vector.load %arg4[%c7_56, %c0_57, %c0_58] : memref<8x8x8xf32, #tpu.memory_space<vmem>>, vector<1x8x8xf32>
    %56 = vector.shape_cast %55 : vector<1x8x8xf32> to vector<8x8xf32>
    %57 = vector.shape_cast %54 : vector<8x8xf32> to vector<1x8x8xf32>
    tpu.vector_store %arg4[%c7_56, %c0_57, %c0_58], %57 {strides = array<i32>} : memref<8x8x8xf32, #tpu.memory_space<vmem>>, vector<1x8x8xf32>,
    return
  }
  func.func @transform_0(%arg0: i32) -> (i32, i32) {
    %c0_i32 = arith.constant 0 : i32
    %c0_i32_0 = arith.constant 0 : i32
    %c0_i32_1 = arith.constant 0 : i32
    return %c0_i32, %c0_i32_0 : i32, i32
  }
  func.func @transform_1(%arg0: i32) -> (i32, i32) {
    %c0_i32 = arith.constant 0 : i32
    %c0_i32_0 = arith.constant 0 : i32
    %c0_i32_1 = arith.constant 0 : i32
    return %c0_i32, %c0_i32_0 : i32, i32
  }
  func.func @transform_2(%arg0: i32) -> (i32, i32, i32) {
    %c0_i32 = arith.constant 0 : i32
    %c0_i32_0 = arith.constant 0 : i32
    %c0_i32_1 = arith.constant 0 : i32
    return %arg0, %c0_i32, %c0_i32_0 : i32, i32, i32
  }
  func.func @transform_3(%arg0: i32) -> (i32, i32, i32) {
    %c0_i32 = arith.constant 0 : i32
    %c0_i32_0 = arith.constant 0 : i32
    %c0_i32_1 = arith.constant 0 : i32
    return %arg0, %c0_i32, %c0_i32_0 : i32, i32, i32
  }
}

</mosaic_0001>

<bundles_post_ra>
// kernel: downsample.1
= control target key start
LH: loop header
LB: loop body
LE: loop exit
PB: predicated region body
PF: predicated region fallthrough
CT: control target
= control target key end

     0   :  { %8 = vsyncpa [#allocation3], 0  ;;  %s1663_s0 = inlined_call_operand.vmem [shape: f32[8,16], index: 0, kind: input, shape index: {}]   ;;  %s1664_s1 = inlined_call_operand.vmem [shape: f32[16,8], index: 1, kind: input, shape index: {}]   ;;  %s1665_s2 = inlined_call_operand.hbm [shape: f32[8,16,16], index: 2, kind: input, shape index: {}]   ;;  %s1666_s3 = inlined_call_operand.hbm [shape: f32[8,8,8], index: 3, kind: output, shape index: {}]  }
   0x1   :  { %9 = vsyncpa [#allocation4], 0  ;;  %s1515_s12 = smov [#allocation2]   ;;  %s1467_s16 = scalar_lea.hbm %s1665_s2, 2048 }
   0x2   :  { %s19_s13 = sshll.u32 %s1515_s12, 4  ;;  %p1468_p0 = scmp.ne.s32.totalorder %s1665_s2, %s1467_s16  ;;  %s20_s13 = int_to_ptr.vmem [resolvable:$true] %s19_s13 }
   0x3   :  { %p1471_p1 = scmp.lt.u32.totalorder %s1467_s16, %s1665_s2 }
   0x5   :  { %p1473_p2 = pnand %p1471_p1, %p1468_p0 }
   0x7   :  { %1476 = shalt.err (!%p1473_p2)
}
   0x8   :  { %s1477_s21 = scalar_lea.vmem %s20_s13, 2048  ;;  %p1482_p4 = scmp.lt.s32.totalorder %s20_s13, %s20_s13 }
   0x9   :  { %p1478_p3 = scmp.ne.s32.totalorder %s20_s13, %s1477_s21  ;;  %p1483_p5 = scmp.lt.s32.totalorder %s1477_s21, %s1477_s21 }
   0xb   :  { %p1484_p6 = por %p1483_p5, %p1482_p4 }
   0xd   :  { %p1485_p7 = pnand %p1484_p6, %p1478_p3 }
   0xf   :  { %1488 = shalt.err (!%p1485_p7)
}
  0x10   :  { %s1516_s22 = smov 128   ;;  %s1517_s23 = smov 8  }
  0x11   :  { %25 = dma.hbm_to_vmem [thread:$0]  %s1665_s2, 2048, %s20_s13, [#allocation3], %s1516_s22, %s1516_s22, %s1517_s23  }
  0x12   :  { %1511 = dma.done.wait [#allocation3], 2048  }
  0x13   :  { %1512 = vsyncadd [#allocation3], 4294965248  ;;  %v1518_v0 = vmov 0.0|0.0   ;;  %vm1519_vm0 = vmmov 0   ;;  %v1520_v1 = vmov 0.0   ;;  %v32_v2 = vld [vmem:[#allocation2] sm:$0xff] }
  0x14   :  { %1412 = vmatprep.subr.bf16.mxu0 %v1518_v0  ;;  %1304 = vmatprep.mubr.msk.f32.mxu0 %vm1519_vm0, %v1520_v1  ;;  %v33_v3 = vld [vmem:[#allocation2 + $0x8] sm:$0xff]  ;;  %v184_v5 = vld [vmem:[#allocation2 + $0x10] sm:$0xff]  ;;  %v185_v6 = vld [vmem:[#allocation2 + $0x18] sm:$0xff]  ;;  %vm34_vm1 = vcmask 130048   ;;  %vm181_vm2 = vcmask 64512  }
  0x15   :  { %1415 = vmatprep.subr.bf16.mxu1 %v1518_v0  ;;  %1311 = vmatprep.mubr.msk.f32.mxu1 %vm1519_vm0, %v1520_v1  ;;  %v1413_v4 = vpack.c.bf16 %v33_v3, %v32_v2  ;;  %v29_v7 = vld [vmem:[%s1663_s0] sm:$0xff]  ;;  %v1419_v8 = vpack.c.bf16 %v185_v6, %v184_v5  ;;  %v333_v10 = vld [vmem:[#allocation2 + $0x28] sm:$0xff]  ;;  %v480_v15 = vld [vmem:[#allocation2 + $0x30] sm:$0xff]  ;;  %s1521_s0 = smov [#allocation5]  }
  0x16   :  { %v332_v9 = vld [vmem:[#allocation2 + $0x20] sm:$0xff]  ;;  %v31_v12 = vld [vmem:[%s1664_s1 + $0x8] sm:$0xff]  ;;  %v481_v16 = vld [vmem:[#allocation2 + $0x38] sm:$0xff] }
  0x17   :  { %1414 = vmatpush3.bf16.msra.mxu0 %v1413_v4  ;;  %v30_v11 = vld [vmem:[%s1664_s1] sm:$0xff]  ;;  %v1425_v13 = vpack.c.bf16 %v333_v10, %v332_v9  ;;  %v1431_v17 = vpack.c.bf16 %v481_v16, %v480_v15  ;;  %v629_v19 = vld [vmem:[#allocation2 + $0x48] sm:$0xff]  ;;  %v776_v21 = vld [vmem:[#allocation2 + $0x50] sm:$0xff]  ;;  %s1224_s1 = sshll.u32 %s1521_s0, 4  ;;  %s1225_s1 = int_to_ptr.vmem [resolvable:$true] %s1224_s1 }
  0x18   :  { %1418 = vmatprep.subr.bf16.mxu0 %v1518_v0  ;;  %v1576_v14 = vpack.c.bf16 %v31_v12, %v30_v11  ;;  %v628_v18 = vld [vmem:[#allocation2 + $0x40] sm:$0xff]  ;;  %v777_v22 = vld [vmem:[#allocation2 + $0x58] sm:$0xff]  ;;  %v925_v25 = vld [vmem:[#allocation2 + $0x68] sm:$0xff]  ;;  %s1489_s4 = scalar_lea.vmem %s1225_s1, 1024  ;;  %p1494_p9 = scmp.lt.s32.totalorder %s1225_s1, %s1225_s1 }
  0x19   :  { %v1437_v20 = vpack.c.bf16 %v629_v19, %v628_v18  ;;  %v1443_v23 = vpack.c.bf16 %v777_v22, %v776_v21  ;;  %v924_v24 = vld [vmem:[#allocation2 + $0x60] sm:$0xff]  ;;  %v1072_v27 = vld [vmem:[#allocation2 + $0x70] sm:$0xff]  ;;  %v1073_v28 = vld [vmem:[#allocation2 + $0x78] sm:$0xff]  ;;  %p1490_p8 = scmp.ne.s32.totalorder %s1225_s1, %s1489_s4  ;;  %p1495_p10 = scmp.lt.s32.totalorder %s1489_s4, %s1489_s4 }
  0x1a   :  { %1305 = vmatmul.mubr.msk.f32.vlgmr.msra.gmra.mrb[0].mxu0 %vm34_vm1, %v29_v7  ;;  %1417 = vmatpush3.bf16.msra.mxu1 %v1576_v14  ;;  %v1449_v26 = vpack.c.bf16 %v925_v25, %v924_v24  ;;  %v1455_v29 = vpack.c.bf16 %v1073_v28, %v1072_v27 }
  0x1b   :  { %1420 = vmatpush3.bf16.msra.mxu0 %v1419_v8  ;;  %1318 = vmatprep.mubr.msk.f32.mxu0 %vm1519_vm0, %v1520_v1  ;;  %p1496_p11 = por %p1495_p10, %p1494_p9 }
  0x1c   :  { %1424 = vmatprep.subr.bf16.mxu0 %v1518_v0  ;;  %1421 = vmatprep.subr.bf16.mxu1 %v1518_v0 }
  0x1d   :  { %p1497_p12 = pnand %p1496_p11, %p1490_p8 }
  0x1e   :  { %1319 = vmatmul.mubr.msk.f32.vlgmr.msra.gmra.mrb[2].mxu0 %vm34_vm1, %v29_v7 }
  0x1f   :  { %1426 = vmatpush3.bf16.msra.mxu0 %v1425_v13  ;;  %1332 = vmatprep.mubr.msk.f32.mxu0 %vm1519_vm0, %v1520_v1 }
  0x20   :  { %1430 = vmatprep.subr.bf16.mxu0 %v1518_v0 }
  0x22   :  { %1333 = vmatmul.mubr.msk.f32.vlgmr.msra.gmra.mrb[4].mxu0 %vm34_vm1, %v29_v7 }
  0x23   :  { %1432 = vmatpush3.bf16.msra.mxu0 %v1431_v17  ;;  %1346 = vmatprep.mubr.msk.f32.mxu0 %vm1519_vm0, %v1520_v1 }
  0x24   :  { %1436 = vmatprep.subr.bf16.mxu0 %v1518_v0 }
  0x26   :  { %1347 = vmatmul.mubr.msk.f32.vlgmr.msra.gmra.mrb[6].mxu0 %vm34_vm1, %v29_v7 }
  0x27   :  { %1438 = vmatpush3.bf16.msra.mxu0 %v1437_v20  ;;  %1360 = vmatprep.mubr.msk.f32.mxu0 %vm1519_vm0, %v1520_v1 }
  0x28   :  { %1442 = vmatprep.subr.bf16.mxu0 %v1518_v0 }
  0x2a   :  { %1361 = vmatmul.mubr.msk.f32.vlgmr.msra.gmra.mrb[8].mxu0 %vm34_vm1, %v29_v7 }
  0x2b   :  { %1444 = vmatpush3.bf16.msra.mxu0 %v1443_v23  ;;  %1374 = vmatprep.mubr.msk.f32.mxu0 %vm1519_vm0, %v1520_v1 }
  0x2c   :  { %1448 = vmatprep.subr.bf16.mxu0 %v1518_v0 }
  0x2e   :  { %1375 = vmatmul.mubr.msk.f32.vlgmr.msra.gmra.mrb[10].mxu0 %vm34_vm1, %v29_v7 }
  0x2f   :  { %1450 = vmatpush3.bf16.msra.mxu0 %v1449_v26  ;;  %1388 = vmatprep.mubr.msk.f32.mxu0 %vm1519_vm0, %v1520_v1 }
  0x30   :  { %1454 = vmatprep.subr.bf16.mxu0 %v1518_v0 }
  0x32   :  { %1389 = vmatmul.mubr.msk.f32.vlgmr.msra.gmra.mrb[12].mxu0 %vm34_vm1, %v29_v7 }
  0x33   :  { %1456 = vmatpush3.bf16.msra.mxu0 %v1455_v29  ;;  %1402 = vmatprep.mubr.msk.f32.mxu0 %vm1519_vm0, %v1520_v1 }
  0x36   :  { %1403 = vmatmul.mubr.msk.f32.vlgmr.msra.gmra.mrb[14].mxu0 %vm34_vm1, %v29_v7 }
  0xed   :  { %v104_v30 = vpop.f32.mrb[0].mxu0 }
  0xee   :  { %v1306_v31 = vpop.f32.mrb[1].mxu0  ;;  %1312 = vmatmul.mubr.msk.f32.vlgmr.msra.gmra.mrb[0].mxu1 %vm34_vm1, %v104_v30 }
  0xef   :  { %1423 = vmatpush3.bf16.msra.mxu1 %v1576_v14  ;;  %1325 = vmatprep.mubr.msk.f32.mxu1 %vm1519_vm0, %v1520_v1 }
  0xf0   :  { %1427 = vmatprep.subr.bf16.mxu1 %v1518_v0 }
  0xf1   :  { %v252_v32 = vpop.f32.mrb[2].mxu0 }
  0xf2   :  { %v1320_v33 = vpop.f32.mrb[3].mxu0  ;;  %1326 = vmatmul.mubr.msk.f32.vlgmr.msra.gmra.mrb[2].mxu1 %vm34_vm1, %v252_v32 }
  0xf3   :  { %1429 = vmatpush3.bf16.msra.mxu1 %v1576_v14  ;;  %1339 = vmatprep.mubr.msk.f32.mxu1 %vm1519_vm0, %v1520_v1 }
  0xf4   :  { %1433 = vmatprep.subr.bf16.mxu1 %v1518_v0 }
  0xf5   :  { %v400_v34 = vpop.f32.mrb[4].mxu0 }
  0xf6   :  { %v1334_v35 = vpop.f32.mrb[5].mxu0  ;;  %1340 = vmatmul.mubr.msk.f32.vlgmr.msra.gmra.mrb[4].mxu1 %vm34_vm1, %v400_v34 }
  0xf7   :  { %1435 = vmatpush3.bf16.msra.mxu1 %v1576_v14  ;;  %1353 = vmatprep.mubr.msk.f32.mxu1 %vm1519_vm0, %v1520_v1 }
  0xf8   :  { %1439 = vmatprep.subr.bf16.mxu1 %v1518_v0 }
  0xf9   :  { %v548_v36 = vpop.f32.mrb[6].mxu0 }
  0xfa   :  { %v1348_v37 = vpop.f32.mrb[7].mxu0  ;;  %1354 = vmatmul.mubr.msk.f32.vlgmr.msra.gmra.mrb[6].mxu1 %vm34_vm1, %v548_v36 }
  0xfb   :  { %1441 = vmatpush3.bf16.msra.mxu1 %v1576_v14  ;;  %1367 = vmatprep.mubr.msk.f32.mxu1 %vm1519_vm0, %v1520_v1 }
  0xfc   :  { %1445 = vmatprep.subr.bf16.mxu1 %v1518_v0 }
  0xfd   :  { %v696_v38 = vpop.f32.mrb[8].mxu0 }
  0xfe   :  { %v1362_v39 = vpop.f32.mrb[9].mxu0  ;;  %1368 = vmatmul.mubr.msk.f32.vlgmr.msra.gmra.mrb[8].mxu1 %vm34_vm1, %v696_v38 }
  0xff   :  { %1447 = vmatpush3.bf16.msra.mxu1 %v1576_v14  ;;  %1381 = vmatprep.mubr.msk.f32.mxu1 %vm1519_vm0, %v1520_v1 }
 0x100   :  { %1451 = vmatprep.subr.bf16.mxu1 %v1518_v0 }
 0x101   :  { %v844_v40 = vpop.f32.mrb[10].mxu0 }
 0x102   :  { %v1376_v41 = vpop.f32.mrb[11].mxu0  ;;  %1382 = vmatmul.mubr.msk.f32.vlgmr.msra.gmra.mrb[10].mxu1 %vm34_vm1, %v844_v40 }
 0x103   :  { %1453 = vmatpush3.bf16.msra.mxu1 %v1576_v14  ;;  %1395 = vmatprep.mubr.msk.f32.mxu1 %vm1519_vm0, %v1520_v1 }
 0x104   :  { %1457 = vmatprep.subr.bf16.mxu1 %v1518_v0 }
 0x105   :  { %v992_v42 = vpop.f32.mrb[12].mxu0 }
 0x106   :  { %v1390_v43 = vpop.f32.mrb[13].mxu0  ;;  %1396 = vmatmul.mubr.msk.f32.vlgmr.msra.gmra.mrb[12].mxu1 %vm34_vm1, %v992_v42 }
 0x107   :  { %1459 = vmatpush3.bf16.msra.mxu1 %v1576_v14  ;;  %1409 = vmatprep.mubr.msk.f32.mxu1 %vm1519_vm0, %v1520_v1 }
 0x109   :  { %v1140_v44 = vpop.f32.mrb[14].mxu0 }
 0x10a   :  { %v1404_v45 = vpop.f32.mrb[15].mxu0  ;;  %1410 = vmatmul.mubr.msk.f32.vlgmr.msra.gmra.mrb[14].mxu1 %vm34_vm1, %v1140_v44 }
 0x1c1   :  { %v177_v46 = vpop.f32.mrb[0].mxu1 }
 0x1c2   :  { %182 = vst.msk [vmem:[#allocation5] sm:$0xff] %vm181_vm2, %v177_v46  ;;  %v1313_v47 = vpop.f32.mrb[1].mxu1 }
 0x1c5   :  { %v325_v48 = vpop.f32.mrb[2].mxu1 }
 0x1c6   :  { %330 = vst.msk [vmem:[#allocation5 + $0x8] sm:$0xff] %vm181_vm2, %v325_v48  ;;  %v1327_v49 = vpop.f32.mrb[3].mxu1 }
 0x1c9   :  { %v473_v50 = vpop.f32.mrb[4].mxu1 }
 0x1ca   :  { %478 = vst.msk [vmem:[#allocation5 + $0x10] sm:$0xff] %vm181_vm2, %v473_v50  ;;  %v1341_v51 = vpop.f32.mrb[5].mxu1 }
 0x1cd   :  { %v621_v52 = vpop.f32.mrb[6].mxu1 }
 0x1ce   :  { %626 = vst.msk [vmem:[#allocation5 + $0x18] sm:$0xff] %vm181_vm2, %v621_v52  ;;  %v1355_v53 = vpop.f32.mrb[7].mxu1 }
 0x1d1   :  { %v769_v54 = vpop.f32.mrb[8].mxu1 }
 0x1d2   :  { %774 = vst.msk [vmem:[#allocation5 + $0x20] sm:$0xff] %vm181_vm2, %v769_v54  ;;  %v1369_v55 = vpop.f32.mrb[9].mxu1 }
 0x1d5   :  { %v917_v56 = vpop.f32.mrb[10].mxu1 }
 0x1d6   :  { %922 = vst.msk [vmem:[#allocation5 + $0x28] sm:$0xff] %vm181_vm2, %v917_v56  ;;  %v1383_v57 = vpop.f32.mrb[11].mxu1 }
 0x1d9   :  { %v1065_v58 = vpop.f32.mrb[12].mxu1 }
 0x1da   :  { %1070 = vst.msk [vmem:[#allocation5 + $0x30] sm:$0xff] %vm181_vm2, %v1065_v58  ;;  %v1397_v59 = vpop.f32.mrb[13].mxu1 }
 0x1dd   :  { %v1213_v60 = vpop.f32.mrb[14].mxu1 }
 0x1de   :  { %1218 = vst.msk [vmem:[#allocation5 + $0x38] sm:$0xff] %vm181_vm2, %v1213_v60  ;;  %v1411_v61 = vpop.f32.mrb[15].mxu1 }
 0x1df   :  { %1500 = shalt.err (!%p1497_p12)
}
 0x1e0   :  { %s1501_s7 = scalar_lea.hbm %s1666_s3, 1024 }
 0x1e1   :  { %p1502_p13 = scmp.ne.s32.totalorder %s1666_s3, %s1501_s7  ;;  %p1505_p0 = scmp.lt.u32.totalorder %s1501_s7, %s1666_s3 }
 0x1e3   :  { %p1507_p1 = pnand %p1505_p0, %p1502_p13 }
 0x1e5   :  { %1510 = shalt.err (!%p1507_p1)
}
 0x1e6   :  { %1230 = dma.vmem_to_hbm [thread:$0]  %s1225_s1, 1024, %s1666_s3, [#allocation4], %s1516_s22, %s1516_s22, %s1517_s23  }
 0x1e7   :  { %1513 = dma.done.wait [#allocation4], 1024  }
 0x1e8   :  { %1514 = vsyncadd [#allocation4], 4294966272 }
 0x1e9   :  { %1234 = vsyncpa [#allocation3], 1 }
 0x1ea   :  { %1235 = vsyncpa [#allocation4], 1 }

</bundles_post_ra>
